<compile_context>
chip_gen: v5e
topology: v5e:2x2
jax: 0.10.0
libtpu: 0.0.40
codegen_flags: <defaults>
</compile_context>

<pallas_src>
import functools
import math

import jax
import jax.numpy as jnp
from jax.experimental import pallas as pl
from jax.experimental.pallas import tpu as pltpu


def _round_up(x, m):
    return ((x + m - 1) // m) * m


def _vmem_capacity_bytes():
    """Physical VMEM of the current TPU generation (fallback: v7x's 64 MiB)."""
    try:
        return int(pltpu.get_tpu_info().vmem_capacity_bytes)
    except Exception:
        return 64 << 20


def mdn_fused_kernel(x_ref, w_ref, b_ref, y_ref, *, pi_pad, mu_pad):
    # One fused MXU matmul for all three heads.  Output columns are laid out
    # as [pi segment (pi_pad) | mu segment (mu_pad) | sigma segment (rest)],
    # each a multiple of 128 lanes, so every store below is a full unmasked
    # lane-dense vst and every slice is tile-aligned.
    y = jnp.dot(x_ref[...], w_ref[...], preferred_element_type=jnp.float32)
    y = y + b_ref[...]                                    # (tb, n_pad)

    # --- pi head: softmax confined to its own 128-aligned segment.  Padded pi
    # columns carry a -1e30 bias, so exp() maps them to 0 and they drop out of
    # the sum without any lane masking.
    pi_logits = y[:, :pi_pad]
    pi_max = jnp.max(pi_logits, axis=1, keepdims=True)
    pi_exp = jnp.exp(pi_logits - pi_max)
    pi_sum = jnp.sum(pi_exp, axis=1, keepdims=True)
    y_ref[:, :pi_pad] = pi_exp / pi_sum                   # exact divide

    # --- mu head: straight pass-through of its segment.
    y_ref[:, pi_pad:pi_pad + mu_pad] = y[:, pi_pad:pi_pad + mu_pad]

    # --- sigma head: exp only on its own segment (EUP).
    y_ref[:, pi_pad + mu_pad:] = jnp.exp(y[:, pi_pad + mu_pad:])


def init_mdn_params(key, input_dim, output_dim, n_gaussians):
    """Deterministic init mimicking torch.nn.Linear default (uniform +-1/sqrt(fan_in)).
    Weights are stored as (in_features, out_features)."""
    gd = n_gaussians * output_dim
    bound = 1.0 / math.sqrt(input_dim)
    k = jax.random.split(key, 6)
    pi_w = jax.random.uniform(k[0], (input_dim, n_gaussians), jnp.float32, -bound, bound)
    pi_b = jax.random.uniform(k[1], (1, n_gaussians), jnp.float32, -bound, bound)
    mu_w = jax.random.uniform(k[2], (input_dim, gd), jnp.float32, -bound, bound)
    mu_b = jax.random.uniform(k[3], (1, gd), jnp.float32, -bound, bound)
    sg_w = jax.random.uniform(k[4], (input_dim, gd), jnp.float32, -bound, bound)
    sg_b = jax.random.uniform(k[5], (1, gd), jnp.float32, -bound, bound)
    return pi_w, pi_b, mu_w, mu_b, sg_w, sg_b


def prepare_mdn_params(params, *, input_dim, output_dim, n_gaussians):
    """One-time packing of the three heads into a lane-aligned fused slab.

    Layout: [ pi | pad->128 | mu | pad->mult128 | sigma | pad->mult128 ].
    Padded pi bias columns are set to -1e30 so the in-kernel softmax over the
    whole pi segment ignores them.
    """
    pi_w, pi_b, mu_w, mu_b, sg_w, sg_b = params
    gd = n_gaussians * output_dim
    pi_pad = _round_up(n_gaussians, 128)
    mu_pad = _round_up(gd, 128)
    sg_pad = _round_up(gd, 128)
    n_pad = pi_pad + mu_pad + sg_pad

    w_cat = jnp.zeros((input_dim, n_pad), jnp.float32)
    w_cat = w_cat.at[:, :n_gaussians].set(pi_w)
    w_cat = w_cat.at[:, pi_pad:pi_pad + gd].set(mu_w)
    w_cat = w_cat.at[:, pi_pad + mu_pad:pi_pad + mu_pad + gd].set(sg_w)

    b_cat = jnp.zeros((1, n_pad), jnp.float32)
    b_cat = b_cat.at[:, :pi_pad].set(-1e30)        # padded pi lanes -> softmax no-op
    b_cat = b_cat.at[:, :n_gaussians].set(pi_b)
    b_cat = b_cat.at[:, pi_pad:pi_pad + gd].set(mu_b)
    b_cat = b_cat.at[:, pi_pad + mu_pad:pi_pad + mu_pad + gd].set(sg_b)

    return dict(w_cat=w_cat, b_cat=b_cat,
                pi_pad=pi_pad, mu_pad=mu_pad, sg_pad=sg_pad,
                n_gaussians=n_gaussians, output_dim=output_dim)


def mdn_forward(x, fused, *, tb=None):
    """MDN forward with a single fused-head Pallas kernel, batch-tiled."""
    B, input_dim = x.shape
    w_cat, b_cat = fused["w_cat"], fused["b_cat"]
    pi_pad, mu_pad, sg_pad = fused["pi_pad"], fused["mu_pad"], fused["sg_pad"]
    n_gaussians, output_dim = fused["n_gaussians"], fused["output_dim"]
    gd = n_gaussians * output_dim
    n_pad = pi_pad + mu_pad + sg_pad
    assert w_cat.shape == (input_dim, n_pad)

    cap = _vmem_capacity_bytes()
    budget = int(cap * 0.85)           # leave compiler-scratch headroom

    if tb is None:
        # Small batches: one grid step (no per-step pipeline overhead; no
        # pointless split on single-TC v5e/v6e or for tiny per-core work on
        # v7x).  Large batches: 512-row tiles (tile sweeps reach ~85% of HBM
        # roofline at >=512 rows); v7x's two cores then share the parallel
        # grid axis automatically.
        tb = max(8, _round_up(B, 8)) if B <= 512 else 512

    def footprint(tb_):
        # double-buffered x + out blocks, 2x resident fused weight + bias,
        # plus slack for compiler scratch.
        return 4 * (2 * tb_ * input_dim + 2 * tb_ * n_pad
                    + 2 * input_dim * n_pad + 2 * n_pad) + (2 << 20)

    while footprint(tb) > budget and tb > 8:
        tb = max(8, _round_up(tb // 2, 8))
    # TODO(synk): for very large heads (input_dim * n_pad * 4B approaching the
    # v7x 64 MiB VMEM) add a second grid axis tiling the fused output columns
    # per head and/or single-buffer the resident weight.

    b_pad = _round_up(B, tb)
    if b_pad != B:
        x = jnp.pad(x, ((0, b_pad - B), (0, 0)))
    grid = (b_pad // tb,)

    vmem_limit = int(min(max(footprint(tb), 4 << 20), budget))

    kernel = functools.partial(mdn_fused_kernel, pi_pad=pi_pad, mu_pad=mu_pad)

    y = pl.pallas_call(
        kernel,
        grid=grid,
        in_specs=[
            pl.BlockSpec((tb, input_dim), lambda i: (i, 0)),
            pl.BlockSpec((input_dim, n_pad), lambda i: (0, 0)),  # resident weight
            pl.BlockSpec((1, n_pad), lambda i: (0, 0)),          # resident bias
        ],
        out_specs=pl.BlockSpec((tb, n_pad), lambda i: (i, 0)),
        out_shape=jax.ShapeDtypeStruct((b_pad, n_pad), jnp.float32),
        compiler_params=pltpu.CompilerParams(
            dimension_semantics=("parallel",),
            vmem_limit_bytes=vmem_limit,
        ),
    )(x, w_cat, b_cat)

    # Minimal unpad/split to match the module interface (consumers that can
    # take the padded slab should index into `y` directly instead).
    pi = y[:B, :n_gaussians]
    mu = y[:B, pi_pad:pi_pad + gd].reshape(B, n_gaussians, output_dim)
    sigma = y[:B, pi_pad + mu_pad:pi_pad + mu_pad + gd].reshape(
        B, n_gaussians, output_dim)
    return pi, mu, sigma


def mdn_reference(x, params, *, n_gaussians, output_dim):
    """Pure-JAX reference matching the PyTorch forward."""
    pi_w, pi_b, mu_w, mu_b, sg_w, sg_b = params
    pi = jax.nn.softmax(x @ pi_w + pi_b[0], axis=1)
    mu = (x @ mu_w + mu_b[0]).reshape(-1, n_gaussians, output_dim)
    sigma = jnp.exp(x @ sg_w + sg_b[0]).reshape(-1, n_gaussians, output_dim)
    return pi, mu, sigma


if __name__ == "__main__":
    # Small shapes consistent with the module's forward.
    B = 16
    input_dim = 32
    output_dim = 4
    n_gaussians = 5

    key = jax.random.PRNGKey(0)
    kx, kp = jax.random.split(key)
    x = jax.random.normal(kx, (B, input_dim), dtype=jnp.float32)
    params = init_mdn_params(kp, input_dim, output_dim, n_gaussians)
    fused = prepare_mdn_params(params, input_dim=input_dim,
                               output_dim=output_dim, n_gaussians=n_gaussians)

    pi, mu, sigma = mdn_forward(x, fused)
    jax.block_until_ready((pi, mu, sigma))

    # Sanity-check against a pure-JAX reference (exact softmax divide now, so
    # tolerances are tight for all three heads).
    pi_r, mu_r, sg_r = mdn_reference(x, params,
                                     n_gaussians=n_gaussians,
                                     output_dim=output_dim)
    assert pi.shape == (B, n_gaussians)
    assert mu.shape == (B, n_gaussians, output_dim)
    assert sigma.shape == (B, n_gaussians, output_dim)
    assert jnp.allclose(pi, pi_r, atol=1e-5, rtol=1e-5)
    assert jnp.allclose(jnp.sum(pi, axis=1), jnp.ones((B,)), atol=1e-5)
    assert jnp.allclose(mu, mu_r, atol=1e-5, rtol=1e-5)
    assert jnp.allclose(sigma, sg_r, atol=1e-5, rtol=1e-5)

    # TODO(synk): MDN.sample uses torch.distributions.Categorical + torch.normal
    # (host-side stochastic sampling loop) and is not part of forward(); not
    # implemented as a kernel.
    print("KERNEL_OK")
</pallas_src>

<mosaic_0001>
module attributes {stable_mosaic.version = 11 : i64} {
  func.func @mdn_fused_kernel(%arg0: i32, %arg1: memref<16x32xf32, #tpu.memory_space<vmem>>, %arg2: memref<32x384xf32, #tpu.memory_space<vmem>>, %arg3: memref<1x384xf32, #tpu.memory_space<vmem>>, %arg4: memref<16x384xf32, #tpu.memory_space<vmem>>) attributes {dimension_semantics = [#tpu.dimension_semantics<parallel>], iteration_bounds = array<i64: 1>, scalar_prefetch = 0 : i64, scratch_operands = 0 : i64, tpu.core_type = #tpu.core_type<tc>, window_params = [{transform_indices = @transform_0, window_bounds = array<i64: 16, 32>}, {pipeline_mode = #tpu.pipeline_mode<synchronous>, transform_indices = @transform_1, window_bounds = array<i64: 32, 384>}, {pipeline_mode = #tpu.pipeline_mode<synchronous>, transform_indices = @transform_2, window_bounds = array<i64: 1, 384>}, {transform_indices = @transform_3, window_bounds = array<i64: 16, 384>}]} {
    %c0 = arith.constant 0 : index
    %c0_0 = arith.constant 0 : index
    %0 = vector.load %arg1[%c0, %c0_0] : memref<16x32xf32, #tpu.memory_space<vmem>>, vector<16x32xf32>
    %c0_1 = arith.constant 0 : index
    %c0_2 = arith.constant 0 : index
    %1 = vector.load %arg2[%c0_1, %c0_2] : memref<32x384xf32, #tpu.memory_space<vmem>>, vector<32x384xf32>
    %cst = arith.constant dense<0.000000e+00> : vector<16x384xf32>
    %2 = tpu.matmul %0, %1, %cst {dimension_numbers = #tpu.dot_dimension_numbers<[1], [0], [0], [1], [0, 0, 1, 1], [], []>} : vector<16x32xf32>, vector<32x384xf32>, vector<16x384xf32> -> vector<16x384xf32>
    %c0_3 = arith.constant 0 : index
    %c0_4 = arith.constant 0 : index
    %3 = vector.load %arg3[%c0_3, %c0_4] : memref<1x384xf32, #tpu.memory_space<vmem>>, vector<1x384xf32>
    %4 = vector.broadcast %3 : vector<1x384xf32> to vector<16x384xf32>
    %5 = arith.addf %2, %4 : vector<16x384xf32>
    %6 = vector.extract_strided_slice %5 {offsets = [0, 0], sizes = [16, 128], strides = [1, 1]} : vector<16x384xf32> to vector<16x128xf32>
    %cst_5 = arith.constant dense<0xFF800000> : vector<16xf32>
    %7 = vector.multi_reduction <maximumf>, %6, %cst_5 [1] : vector<16x128xf32> to vector<16xf32>
    %8 = vector.shape_cast %7 : vector<16xf32> to vector<16x1xf32>
    %9 = vector.broadcast %8 : vector<16x1xf32> to vector<16x128xf32>
    %10 = arith.subf %6, %9 : vector<16x128xf32>
    %11 = math.exp %10 : vector<16x128xf32>
    %cst_6 = arith.constant dense<0.000000e+00> : vector<16xf32>
    %12 = vector.multi_reduction <add>, %11, %cst_6 [1] : vector<16x128xf32> to vector<16xf32>
    %13 = vector.shape_cast %12 : vector<16xf32> to vector<16x1xf32>
    %14 = vector.broadcast %13 : vector<16x1xf32> to vector<16x128xf32>
    %15 = arith.divf %11, %14 : vector<16x128xf32>
    %c0_7 = arith.constant 0 : index
    %c0_8 = arith.constant 0 : index
    %16 = vector.load %arg4[%c0_7, %c0_8] : memref<16x384xf32, #tpu.memory_space<vmem>>, vector<16x128xf32>
    tpu.vector_store %arg4[%c0_7, %c0_8], %15 {strides = array<i32>} : memref<16x384xf32, #tpu.memory_space<vmem>>, vector<16x128xf32>,
    %17 = vector.extract_strided_slice %5 {offsets = [0, 128], sizes = [16, 128], strides = [1, 1]} : vector<16x384xf32> to vector<16x128xf32>
    %c0_9 = arith.constant 0 : index
    %c128 = arith.constant 128 : index
    %18 = vector.load %arg4[%c0_9, %c128] : memref<16x384xf32, #tpu.memory_space<vmem>>, vector<16x128xf32>
    tpu.vector_store %arg4[%c0_9, %c128], %17 {strides = array<i32>} : memref<16x384xf32, #tpu.memory_space<vmem>>, vector<16x128xf32>,
    %19 = vector.extract_strided_slice %5 {offsets = [0, 256], sizes = [16, 128], strides = [1, 1]} : vector<16x384xf32> to vector<16x128xf32>
    %20 = math.exp %19 : vector<16x128xf32>
    %c0_10 = arith.constant 0 : index
    %c256 = arith.constant 256 : index
    %21 = vector.load %arg4[%c0_10, %c256] : memref<16x384xf32, #tpu.memory_space<vmem>>, vector<16x128xf32>
    tpu.vector_store %arg4[%c0_10, %c256], %20 {strides = array<i32>} : memref<16x384xf32, #tpu.memory_space<vmem>>, vector<16x128xf32>,
    return
  }
  func.func @transform_0(%arg0: i32) -> (i32, i32) {
    %c0_i32 = arith.constant 0 : i32
    %c0_i32_0 = arith.constant 0 : i32
    return %arg0, %c0_i32 : i32, i32
  }
  func.func @transform_1(%arg0: i32) -> (i32, i32) {
    %c0_i32 = arith.constant 0 : i32
    %c0_i32_0 = arith.constant 0 : i32
    %c0_i32_1 = arith.constant 0 : i32
    return %c0_i32, %c0_i32_0 : i32, i32
  }
  func.func @transform_2(%arg0: i32) -> (i32, i32) {
    %c0_i32 = arith.constant 0 : i32
    %c0_i32_0 = arith.constant 0 : i32
    %c0_i32_1 = arith.constant 0 : i32
    return %c0_i32, %c0_i32_0 : i32, i32
  }
  func.func @transform_3(%arg0: i32) -> (i32, i32) {
    %c0_i32 = arith.constant 0 : i32
    %c0_i32_0 = arith.constant 0 : i32
    return %arg0, %c0_i32 : i32, i32
  }
}

</mosaic_0001>

<bundles_post_ra>
// kernel: tpu_custom_call.1
= control target key start
LH: loop header
LB: loop body
LE: loop exit
PB: predicated region body
PF: predicated region fallthrough
CT: control target
= control target key end

     0   :  { %8 = vsyncpa [#allocation3], 0  ;;  %s416_s0 = inlined_call_operand.hbm [shape: f32[16,32], index: 0, kind: input, shape index: {}]   ;;  %s417_s1 = inlined_call_operand.hbm [shape: f32[32,384], index: 1, kind: input, shape index: {}]   ;;  %s418_s2 = inlined_call_operand.hbm [shape: f32[1,384], index: 2, kind: input, shape index: {}]   ;;  %s419_s3 = inlined_call_operand.hbm [shape: f32[16,384], index: 3, kind: output, shape index: {}]  }
   0x1   :  { %9 = vsyncpa [#allocation6], 0  ;;  %s28_s14 = sshll.u32 %s417_s1, 4  ;;  %s29_s14 = int_to_ptr.hbm [resolvable:$true] %s28_s14 }
   0x2   :  { %10 = vsyncpa [#allocation4], 0  ;;  %s364_s15 = smov [#allocation5]   ;;  %s15_s19 = sshll.u32 %s416_s0, 4  ;;  %s16_s19 = int_to_ptr.hbm [resolvable:$true] %s15_s19 }
   0x3   :  { %s30_s16 = sshll.u32 %s364_s15, 4  ;;  %s365_s20 = smov 384   ;;  %s31_s16 = int_to_ptr.vmem [resolvable:$true] %s30_s16 }
   0x4   :  { %s366_s21 = smov 24   ;;  %s367_s22 = smov [#allocation2]  }
   0x5   :  { %36 = dma.hbm_to_vmem [thread:$0]  %s29_s14, 1536, %s31_s16, [#allocation6], %s365_s20, %s365_s20, %s366_s21  }
   0x6   :  { %s17_s23 = sshll.u32 %s367_s22, 4  ;;  %s368_s1 = smov 128   ;;  %s18_s23 = int_to_ptr.vmem [resolvable:$true] %s17_s23 }
   0x7   :  { %s369_s24 = smov 8   ;;  %s42_s27 = sshll.u32 %s418_s2, 4  ;;  %s43_s27 = int_to_ptr.hbm [resolvable:$true] %s42_s27 }
   0x8   :  { %23 = dma.hbm_to_vmem [thread:$0]  %s16_s19, 256, %s18_s23, [#allocation3], %s368_s1, %s368_s1, %s369_s24  }
   0x9   :  { %s370_s28 = smov [#allocation7]  }
   0xa   :  { %s44_s0 = sshll.u32 %s370_s28, 4  ;;  %s45_s0 = int_to_ptr.vmem [resolvable:$true] %s44_s0 }
   0xb   :  { %47 = dma.hbm_to_vmem [thread:$0]  %s43_s27, 48, %s45_s0, [#allocation6]  }
   0xc   :  { %358 = dma.done.wait [#allocation3], 256  }
   0xd   :  { %359 = vsyncadd [#allocation3], 4294967040 }
   0xe   :  { %360 = dma.done.wait [#allocation6], 1584  }
   0xf   :  { %361 = vsyncadd [#allocation6], 4294965712  ;;  %v71_v0 = vld [vmem:[#allocation5 + $0x48] sm:$0xff]  ;;  %v68_v1 = vld [vmem:[#allocation5 + $0x30] sm:$0xff]  ;;  %vm82_vm0 = vcmask 261120   ;;  %s371_s2 = smov [#allocation8]  }
  0x10   :  { %101 = vmatpush.msra.mxu0 %v71_v0  ;;  %238 = vmatpush.msra.mxu3 %v71_v0  ;;  %v65_v2 = vld [vmem:[#allocation5 + $0x18] sm:$0xff]  ;;  %v62_v3 = vld [vmem:[#allocation5] sm:$0xff]  ;;  %v60_v4 = vld [vmem:[#allocation2] sm:$0xff]  ;;  %s216_s29 = sshll.u32 %s371_s2, 4  ;;  %s218_s5 = sshll.u32 %s419_s3, 4  ;;  %s217_s29 = int_to_ptr.vmem [resolvable:$true] %s216_s29  ;;  %s219_s5 = int_to_ptr.hbm [resolvable:$true] %s218_s5 }
  0x11   :  { %v61_v5 = vld [vmem:[#allocation2 + $0x8] sm:$0xff]  ;;  %v70_v7 = vld [vmem:[#allocation5 + $0x40] sm:$0xff]  ;;  %v67_v14 = vld [vmem:[#allocation5 + $0x28] sm:$0xff] }
  0x12   :  { %102 = vmatpush.msra.mxu0 %v68_v1  ;;  %239 = vmatpush.msra.mxu3 %v68_v1  ;;  %v73_v6 = vld [vmem:[#allocation5 + $0x58] sm:$0xff]  ;;  %v74_v8 = vld [vmem:[#allocation7] sm:$0x7]  ;;  %v64_v15 = vld [vmem:[#allocation5 + $0x10] sm:$0xff] }
  0x13   :  { %147 = vmatpush.msra.mxu2 %v73_v6  ;;  %v76_v9 = vperm.slane %v74_v8, 0  ;;  %v72_v16 = vld [vmem:[#allocation5 + $0x50] sm:$0xff]  ;;  %v69_v17 = vld [vmem:[#allocation5 + $0x38] sm:$0xff]  ;;  %v66_v18 = vld [vmem:[#allocation5 + $0x20] sm:$0xff]  ;;  %v78_v28 = vperm.slane %v74_v8, 2  ;;  %v77_v33 = vperm.slane %v74_v8, 1 }
  0x14   :  { %103 = vmatpush.msra.mxu0 %v65_v2  ;;  %240 = vmatpush.msra.mxu3 %v65_v2  ;;  %v63_v19 = vld [vmem:[#allocation5 + $0x8] sm:$0xff] }
  0x15   :  { %148 = vmatpush.msra.mxu2 %v70_v7  ;;  %124 = vmatpush.msra.mxu1 %v72_v16 }
  0x16   :  { %104 = vmatpush.msra.mxu0 %v62_v3  ;;  %241 = vmatpush.msra.mxu3 %v62_v3 }
  0x17   :  { %232 = vmatmul.msk.f32.vlgmr.msra.gmra.mxu0 %vm82_vm0, %v60_v4  ;;  %233 = vmatmul.msk.f32.vlgmr.msra.gmra.mxu3 %vm82_vm0, %v61_v5 }
  0x18   :  { %149 = vmatpush.msra.mxu2 %v67_v14  ;;  %125 = vmatpush.msra.mxu1 %v69_v17 }
  0x1a   :  { %150 = vmatpush.msra.mxu2 %v64_v15  ;;  %126 = vmatpush.msra.mxu1 %v66_v18 }
  0x1b   :  { %236 = vmatmul.msk.f32.vlgmr.msra.gmra.mxu2 %vm82_vm0, %v60_v4 }
  0x1c   :  { %127 = vmatpush.msra.mxu1 %v63_v19 }
  0x1d   :  { %234 = vmatmul.msk.f32.vlgmr.msra.gmra.mxu1 %vm82_vm0, %v60_v4 }
  0x23   :  { %237 = vmatmul.msk.f32.gmra.mxu2 %vm82_vm0, %v61_v5 }
  0x25   :  { %235 = vmatmul.msk.f32.gmra.mxu1 %vm82_vm0, %v61_v5 }
  0x94   :  { %v106_v10 = vpop.f32.mrf.mxu0 }
  0x95   :  { %v107_v11 = vadd.f32 %v106_v10, %v76_v9 }
  0x97   :  { %158 = vmax.xlane.f32.xlu0 %v107_v11 }
  0x9a   :  { %v109_v12 = vpop.f32.mrf.mxu3  ;;  %v129_v35 = vpop.f32.mrf.mxu1 }
  0x9b   :  { %v110_v13 = vadd.f32 %v109_v12, %v76_v9  ;;  %v130_v36 = vadd.f32 %v129_v35, %v77_v33 }
  0x9d   :  { %204 = vst [vmem:[#allocation8 + $0x8] sm:$0xff] %v130_v36 }
  0x9e   :  { %v152_v29 = vpop.f32.mrf.mxu2 }
  0x9f   :  { %160 = vmax.xlane.f32.xlu0 %v110_v13  ;;  %v153_v30 = vadd.f32 %v152_v29, %v78_v28 }
  0xa1   :  { %v206_v31 = vmul.f32 1.442695, %v153_v30 }
  0xa2   :  { %v132_v39 = vpop.f32.mrf.mxu1 }
  0xa3   :  { %v133_v40 = vadd.f32 %v132_v39, %v77_v33 }
  0xa5   :  { %205 = vst [vmem:[#allocation8 + $0x20] sm:$0xff] %v133_v40 }
  0xa6   :  { %v155_v32 = vpop.f32.mrf.mxu2 }
  0xa7   :  { %v156_v34 = vadd.f32 %v155_v32, %v78_v28 }
  0xa9   :  { %v208_v38 = vmul.f32 1.442695, %v156_v34 }
 0x10a   :  { %v159_v20 = vpop.xlane.xlu0 %158 }
 0x10b   :  { %v162_v21 = vsub.f32 %v107_v11, %v159_v20 }
 0x10d   :  { %v164_v22 = vmul.f32 1.442695, %v162_v21 }
 0x10f   :  { %250 = vpow2.f32 %v164_v22 }
 0x112   :  { %v161_v23 = vpop.xlane.xlu0 %160 }
 0x113   :  { %v163_v24 = vsub.f32 %v110_v13, %v161_v23 }
 0x115   :  { %v251_v25 = vpop.eup %250  ;;  %v166_v26 = vmul.f32 1.442695, %v163_v24 }
 0x116   :  { %168 = vadd.xlane.f32.xlu1 %v251_v25 }
 0x117   :  { %252 = vpow2.f32 %v166_v26 }
 0x118   :  { %254 = vpow2.f32 %v206_v31 }
 0x119   :  { %256 = vpow2.f32 %v208_v38 }
 0x11d   :  { %v253_v27 = vpop.eup %252 }
 0x11e   :  { %170 = vadd.xlane.f32.xlu1 %v253_v27  ;;  %v255_v37 = vpop.eup %254 }
 0x11f   :  { %210 = vst [vmem:[#allocation8 + $0x10] sm:$0xff] %v255_v37  ;;  %v257_v41 = vpop.eup %256 }
 0x120   :  { %211 = vst [vmem:[#allocation8 + $0x28] sm:$0xff] %v257_v41 }
 0x189   :  { %v169_v42 = vpop.xlane.xlu1 %168 }
 0x18a   :  { %258 = vrcp.f32 %v169_v42  ;;  %v183_v47 = vand.u32 2147483648, %v169_v42  ;;  %v181_v49 = vand.u32 2147483647, %v169_v42  ;;  %vm177_vm2 = vweird.f32 %v169_v42 }
 0x18c   :  { %v184_v52 = vor.u32 1.1754944e-38, %v183_v47  ;;  %vm182_vm4 = vcmp.eq.f32.partialorder %v181_v49, 8.507059e+37 }
 0x190   :  { %v259_v43 = vpop.eup %258 }
 0x191   :  { %v173_v44 = vmul.f32 %v259_v43, %v169_v42  ;;  %v171_v45 = vpop.xlane.xlu1 %170  ;;  %vm178_vm1 = vweird.f32 %v259_v43 }
 0x192   :  { %260 = vrcp.f32 %v171_v45  ;;  %vm179_vm3 = vmor %vm177_vm2, %vm178_vm1  ;;  %v198_v58 = vand.u32 2147483648, %v171_v45  ;;  %v196_v60 = vand.u32 2147483647, %v171_v45  ;;  %vm192_vm6 = vweird.f32 %v171_v45 }
 0x193   :  { %v174_v46 = vsub.f32 1.0, %v173_v44 }
 0x194   :  { %v199_v62 = vor.u32 1.1754944e-38, %v198_v58  ;;  %vm197_vm8 = vcmp.eq.f32.partialorder %v196_v60, 8.507059e+37 }
 0x195   :  { %v175_v48 = vmul.f32 %v259_v43, %v174_v46 }
 0x197   :  { %v176_v50 = vadd.f32 %v259_v43, %v175_v48 }
 0x198   :  { %v261_v51 = vpop.eup %260 }
 0x199   :  { %v180_v53 = vsel %vm179_vm3, %v259_v43, %v176_v50  ;;  %v188_v54 = vmul.f32 %v261_v51, %v171_v45  ;;  %vm193_vm5 = vweird.f32 %v261_v51 }
 0x19a   :  { %v185_v55 = vsel %vm182_vm4, %v184_v52, %v180_v53  ;;  %vm194_vm7 = vmor %vm192_vm6, %vm193_vm5 }
 0x19b   :  { %v186_v56 = vmul.f32 %v251_v25, %v185_v55  ;;  %v189_v57 = vsub.f32 1.0, %v188_v54 }
 0x19d   :  { %202 = vst [vmem:[#allocation8] sm:$0xff] %v186_v56  ;;  %v190_v59 = vmul.f32 %v261_v51, %v189_v57 }
 0x19f   :  { %v191_v61 = vadd.f32 %v261_v51, %v190_v59 }
 0x1a1   :  { %v195_v63 = vsel %vm194_vm7, %v261_v51, %v191_v61 }
 0x1a2   :  { %v200_v0 = vsel %vm197_vm8, %v199_v62, %v195_v63 }
 0x1a3   :  { %v201_v1 = vmul.f32 %v253_v27, %v200_v0 }
 0x1a5   :  { %203 = vst [vmem:[#allocation8 + $0x18] sm:$0xff] %v201_v1 }
 0x1a6   :  { %224 = dma.vmem_to_hbm [thread:$0]  %s217_s29, 768, %s219_s5, [#allocation4], %s365_s20, %s365_s20, %s366_s21  }
 0x1a7   :  { %362 = dma.done.wait [#allocation4], 768  }
 0x1a8   :  { %363 = vsyncadd [#allocation4], 4294966528 }
 0x1a9   :  { %229 = vsyncpa [#allocation3], 1 }
 0x1aa   :  { %230 = vsyncpa [#allocation6], 1 }
 0x1ab   :  { %231 = vsyncpa [#allocation4], 1 }

</bundles_post_ra>
